<compile_context>
chip_gen: v6e
topology: v6e:2x2x1
jax: 0.10.0
libtpu: 0.0.40
codegen_flags: <defaults>
</compile_context>

<pallas_src>
import jax
import jax.numpy as jnp
from jax import lax
from jax.experimental import pallas as pl
from jax.experimental.pallas import tpu as pltpu


def downstream_kernel(x_ref, wb_ref, bb_ref, wf_ref, bf_ref, o_ref):
    # x_ref : (TB, Lh, 2*C)   pairs of adjacent input positions, channels-last
    # wb_ref: (2*C, 256)      block conv weight (within-pair / cross-pair taps)
    # bb_ref: (1, 128)        conv bias tiled for the two positions of a pair
    # wf_ref: (64, O_pad)     FC weight, mean scale 2/L folded in, lane-padded
    # bf_ref: (1, O_pad)
    # o_ref : (1, TB, O_pad)
    TB, Lh, C2 = x_ref.shape
    N2 = TB * Lh

    x2 = x_ref[...].reshape(N2, C2)                       # (N2, 2*C)

    # One MXU matmul produces, for pair row p (positions 2p, 2p+1) of each
    # batch element:
    #   lanes   0: 64 -> W1*x[2p]   + W2*x[2p+1]   (within-pair part of h[2p])
    #   lanes  64:128 -> W0*x[2p]   + W1*x[2p+1]   (within-pair part of h[2p+1])
    #   lanes 128:192 -> W0*x[2p+1]                (belongs to h[2p+2], next row)
    #   lanes 192:256 -> W2*x[2p]                  (belongs to h[2p-1], prev row)
    y = jnp.dot(x2, wb_ref[...], preferred_element_type=jnp.float32)  # (N2, 256)

    within = y[:, 0:128]
    cross = y[:, 128:256]
    # Align the cross contributions with the rows they belong to (XLU rotates,
    # no concatenate copies).  roll(+1): row p reads row p-1; roll(N2-1): row p
    # reads row p+1.
    cross_from_prev = pltpu.roll(cross, shift=1, axis=0)
    cross_from_next = pltpu.roll(cross, shift=N2 - 1, axis=0)

    pidx = lax.broadcasted_iota(jnp.int32, (N2, 128), 0) % Lh   # pair index in element
    lane = lax.broadcasted_iota(jnp.int32, (N2, 128), 1)
    first = lane < 64
    # Zero the padding=1 boundaries.  Rows with pidx==0 / pidx==Lh-1 are also
    # exactly the rows whose rolled neighbor crosses a batch-element (or roll
    # wrap-around) boundary, so this mask kills that leakage too.
    keep_prev = first & (pidx > 0)
    keep_next = jnp.logical_not(first) & (pidx < Lh - 1)
    cross_add = (jnp.where(keep_prev, cross_from_prev, 0.0)
                 + jnp.where(keep_next, cross_from_next, 0.0))

    h = jnp.maximum(within + cross_add + bb_ref[...], 0.0)      # ReLU, (N2, 128)

    # MaxPool1d(2): lanes 0:64 hold position 2p, lanes 64:128 hold position 2p+1.
    pooled = jnp.maximum(h[:, 0:64], h[:, 64:128])               # (N2, 64)
    # mean over the pooled length: the 2/L scale is folded into wf_ref.
    summed = jnp.sum(pooled.reshape(TB, Lh, 64), axis=1)         # (TB, 64)

    out = jnp.dot(summed, wf_ref[...], preferred_element_type=jnp.float32) + bf_ref[...]
    o_ref[0] = out                                               # (TB, O_pad)


def _choose_batch_tile(B, Lh):
    """~2048 flattened pair-rows per grid step; >=2 tiles when B allows (feeds
    both v7x TensorCores); multiple of 8 when possible for unmasked stores."""
    target_rows = 2048
    tb = max(1, target_rows // max(Lh, 1))
    tb = min(tb, B)
    if B >= 2:
        tb = min(tb, -(-B // 2))       # keep at least 2 grid tiles
    if tb >= 8:
        tb = (tb // 8) * 8
    return max(tb, 1)


def downstream_forward(x_ncl, w_conv, b_conv, w_fc, b_fc):
    """Forward pass matching the PyTorch module.

    x_ncl : (B, C_in, L) float32   (PyTorch NCL layout)
    w_conv: (64, C_in, 3) float32  (torch Conv1d weight)
    b_conv: (64,) float32
    w_fc  : (O, 64) float32        (torch Linear weight)
    b_fc  : (O,) float32
    Returns (B, O) float32.
    """
    B, C, L = x_ncl.shape
    O = w_fc.shape[0]
    assert L % 2 == 0, "MaxPool1d(2) tail handling requires even L"
    # TODO(synk): odd-L MaxPool1d trailing-element drop not implemented.
    Lh = L // 2

    # --- trace-time layout prep (no kernel cost) ---
    x_blc = jnp.transpose(x_ncl, (0, 2, 1)).astype(jnp.float32)   # (B, L, C)
    x_pairs = x_blc.reshape(B, Lh, 2 * C)                         # free (row-major) reshape

    # Block-structured fused conv weight (taps k=0,1,2 of the cross-correlation).
    W0 = w_conv[:, :, 0].T.astype(jnp.float32)   # (C, 64)
    W1 = w_conv[:, :, 1].T.astype(jnp.float32)
    W2 = w_conv[:, :, 2].T.astype(jnp.float32)
    Wb = jnp.zeros((2 * C, 256), jnp.float32)
    Wb = Wb.at[:C, 0:64].set(W1)        # h[2p]   <- W1 * x[2p]
    Wb = Wb.at[C:, 0:64].set(W2)        # h[2p]   <- W2 * x[2p+1]
    Wb = Wb.at[:C, 64:128].set(W0)      # h[2p+1] <- W0 * x[2p]
    Wb = Wb.at[C:, 64:128].set(W1)      # h[2p+1] <- W1 * x[2p+1]
    Wb = Wb.at[C:, 128:192].set(W0)     # -> next row's h[2p+2]
    Wb = Wb.at[:C, 192:256].set(W2)     # -> prev row's h[2p-1]
    bb = jnp.concatenate([b_conv, b_conv]).reshape(1, 128).astype(jnp.float32)

    # Lane-dense FC: pad O up to a multiple of 128; fold the 2/L mean scale
    # into the weight (not the bias).
    O_pad = ((O + 127) // 128) * 128
    wf_p = jnp.zeros((64, O_pad), jnp.float32).at[:, :O].set(
        w_fc.T.astype(jnp.float32) * (2.0 / L))
    bf_p = jnp.zeros((1, O_pad), jnp.float32).at[:, :O].set(
        b_fc.astype(jnp.float32)[None, :])

    TB = _choose_batch_tile(B, Lh)
    n_tiles = -(-B // TB)
    B_pad = n_tiles * TB
    if B_pad != B:
        # Zero-pad the batch; padded elements compute garbage that is sliced off
        # and cannot leak into real rows (boundary masks in the kernel).
        x_pairs = jnp.pad(x_pairs, ((0, B_pad - B), (0, 0), (0, 0)))

    out = pl.pallas_call(
        downstream_kernel,
        out_shape=jax.ShapeDtypeStruct((n_tiles, TB, O_pad), jnp.float32),
        grid=(n_tiles,),
        in_specs=[
            pl.BlockSpec((TB, Lh, 2 * C), lambda b: (b, 0, 0)),
            pl.BlockSpec((2 * C, 256), lambda b: (0, 0)),
            pl.BlockSpec((1, 128), lambda b: (0, 0)),
            pl.BlockSpec((64, O_pad), lambda b: (0, 0)),
            pl.BlockSpec((1, O_pad), lambda b: (0, 0)),
        ],
        out_specs=pl.BlockSpec((1, TB, O_pad), lambda b: (b, 0, 0)),
        compiler_params=pltpu.CompilerParams(
            dimension_semantics=("parallel",),
            vmem_limit_bytes=32 * 1024 * 1024),
    )(x_pairs, Wb, bb, wf_p, bf_p)

    return out.reshape(B_pad, O_pad)[:B, :O]


def reference_forward(x_ncl, w_conv, b_conv, w_fc, b_fc):
    """Pure-JAX reference mirroring PyTorch semantics (torch weight layouts)."""
    B, C, L = x_ncl.shape
    xp = jnp.pad(x_ncl, ((0, 0), (0, 0), (1, 1)))
    h = jnp.zeros((B, 64, L), jnp.float32)
    for k in range(3):
        h = h + jnp.einsum('bcl,oc->bol', xp[:, :, k:k + L], w_conv[:, :, k])
    h = h + b_conv[None, :, None]
    h = jnp.maximum(h, 0.0)
    h = h.reshape(B, 64, L // 2, 2).max(axis=-1)   # MaxPool1d(2)
    h = h.mean(axis=-1)                            # mean over pooled length
    return h @ w_fc.T + b_fc[None, :]


if __name__ == "__main__":
    B, C_in, L, O = 2, 4, 16, 8

    key = jax.random.PRNGKey(0)
    kx, kw1, kb1, kw2, kb2 = jax.random.split(key, 5)

    # Deterministic synthetic inputs/params in PyTorch layouts.
    x_ncl = jax.random.normal(kx, (B, C_in, L), jnp.float32)           # NCL input
    w_conv = 0.1 * jax.random.normal(kw1, (64, C_in, 3), jnp.float32)  # Conv1d weight
    b_conv = 0.1 * jax.random.normal(kb1, (64,), jnp.float32)
    w_fc = 0.1 * jax.random.normal(kw2, (O, 64), jnp.float32)          # Linear weight
    b_fc = 0.1 * jax.random.normal(kb2, (O,), jnp.float32)

    out = downstream_forward(x_ncl, w_conv, b_conv, w_fc, b_fc)
    out = jax.block_until_ready(out)

    ref = reference_forward(x_ncl, w_conv, b_conv, w_fc, b_fc)
    assert out.shape == (B, O)
    assert jnp.allclose(out, ref, atol=1e-4, rtol=1e-4), "Pallas kernel mismatch vs reference"

    print("KERNEL_OK")
</pallas_src>

<mosaic_0001>
module attributes {stable_mosaic.version = 11 : i64} {
  func.func @downstream_kernel(%arg0: i32, %arg1: memref<1x8x8xf32, #tpu.memory_space<vmem>>, %arg2: memref<8x256xf32, #tpu.memory_space<vmem>>, %arg3: memref<1x128xf32, #tpu.memory_space<vmem>>, %arg4: memref<64x128xf32, #tpu.memory_space<vmem>>, %arg5: memref<1x128xf32, #tpu.memory_space<vmem>>, %arg6: memref<1x1x128xf32, #tpu.memory_space<vmem>>) attributes {dimension_semantics = [#tpu.dimension_semantics<parallel>], iteration_bounds = array<i64: 2>, scalar_prefetch = 0 : i64, scratch_operands = 0 : i64, tpu.core_type = #tpu.core_type<tc>, window_params = [{transform_indices = @transform_0, window_bounds = array<i64: 1, 8, 8>}, {pipeline_mode = #tpu.pipeline_mode<synchronous>, transform_indices = @transform_1, window_bounds = array<i64: 8, 256>}, {pipeline_mode = #tpu.pipeline_mode<synchronous>, transform_indices = @transform_2, window_bounds = array<i64: 1, 128>}, {pipeline_mode = #tpu.pipeline_mode<synchronous>, transform_indices = @transform_3, window_bounds = array<i64: 64, 128>}, {pipeline_mode = #tpu.pipeline_mode<synchronous>, transform_indices = @transform_4, window_bounds = array<i64: 1, 128>}, {transform_indices = @transform_5, window_bounds = array<i64: 1, 1, 128>}]} {
    %c0 = arith.constant 0 : index
    %c0_0 = arith.constant 0 : index
    %c0_1 = arith.constant 0 : index
    %0 = vector.load %arg1[%c0, %c0_0, %c0_1] : memref<1x8x8xf32, #tpu.memory_space<vmem>>, vector<1x8x8xf32>
    %1 = vector.shape_cast %0 : vector<1x8x8xf32> to vector<8x8xf32>
    %c0_2 = arith.constant 0 : index
    %c0_3 = arith.constant 0 : index
    %2 = vector.load %arg2[%c0_2, %c0_3] : memref<8x256xf32, #tpu.memory_space<vmem>>, vector<8x256xf32>
    %cst = arith.constant dense<0.000000e+00> : vector<8x256xf32>
    %3 = tpu.matmul %1, %2, %cst {dimension_numbers = #tpu.dot_dimension_numbers<[1], [0], [0], [1], [0, 0, 1, 1], [], []>} : vector<8x8xf32>, vector<8x256xf32>, vector<8x256xf32> -> vector<8x256xf32>
    %4 = vector.extract_strided_slice %3 {offsets = [0, 0], sizes = [8, 128], strides = [1, 1]} : vector<8x256xf32> to vector<8x128xf32>
    %5 = vector.extract_strided_slice %3 {offsets = [0, 128], sizes = [8, 128], strides = [1, 1]} : vector<8x256xf32> to vector<8x128xf32>
    %c1_i32 = arith.constant 1 : i32
    %6 = tpu.dynamic_rotate %5 by %c1_i32 dim 0 : vector<8x128xf32>, i32 -> vector<8x128xf32>
    %c7_i32 = arith.constant 7 : i32
    %7 = tpu.dynamic_rotate %5 by %c7_i32 dim 0 : vector<8x128xf32>, i32 -> vector<8x128xf32>
    %8 = tpu.iota {dimensions = array<i32: 0>} : vector<8x128xi32>
    %c8_i32 = arith.constant 8 : i32
    %c0_i32 = arith.constant 0 : i32
    %9 = arith.cmpi eq, %c8_i32, %c0_i32 : i32
    %c1_i32_4 = arith.constant 1 : i32
    %10 = arith.select %9, %c1_i32_4, %c8_i32 : i32
    %11 = vector.broadcast %10 : i32 to vector<8x128xi32>
    %12 = arith.remsi %8, %11 : vector<8x128xi32>
    %c0_i32_5 = arith.constant 0 : i32
    %13 = vector.broadcast %c0_i32_5 : i32 to vector<8x128xi32>
    %14 = arith.cmpi ne, %12, %13 : vector<8x128xi32>
    %c0_i32_6 = arith.constant 0 : i32
    %15 = vector.broadcast %c0_i32_6 : i32 to vector<8x128xi32>
    %16 = arith.cmpi slt, %12, %15 : vector<8x128xi32>
    %c0_i32_7 = arith.constant 0 : i32
    %17 = arith.cmpi slt, %10, %c0_i32_7 : i32
    %18 = vector.broadcast %17 : i1 to vector<8x128xi1>
    %19 = vector.broadcast %18 : vector<8x128xi1> to vector<8x128xi1>
    %20 = arith.xori %16, %19 : vector<8x128xi1>
    %21 = arith.andi %20, %14 : vector<8x128xi1>
    %22 = vector.broadcast %10 : i32 to vector<8x128xi32>
    %23 = arith.addi %12, %22 : vector<8x128xi32>
    %24 = arith.select %21, %23, %12 : vector<8x128xi1>, vector<8x128xi32>
    %25 = tpu.iota {dimensions = array<i32: 1>} : vector<8x128xi32>
    %c64_i32 = arith.constant 64 : i32
    %26 = vector.broadcast %c64_i32 : i32 to vector<8x128xi32>
    %27 = arith.cmpi slt, %25, %26 : vector<8x128xi32>
    %c0_i32_8 = arith.constant 0 : i32
    %28 = vector.broadcast %c0_i32_8 : i32 to vector<8x128xi32>
    %29 = arith.cmpi sgt, %24, %28 : vector<8x128xi32>
    %30 = arith.andi %27, %29 : vector<8x128xi1>
    %cst_9 = arith.constant dense<true> : vector<8x128xi1>
    %31 = arith.xori %27, %cst_9 : vector<8x128xi1>
    %c7_i32_10 = arith.constant 7 : i32
    %32 = vector.broadcast %c7_i32_10 : i32 to vector<8x128xi32>
    %33 = arith.cmpi slt, %24, %32 : vector<8x128xi32>
    %34 = arith.andi %31, %33 : vector<8x128xi1>
    %cst_11 = arith.constant 0.000000e+00 : f32
    %35 = vector.broadcast %cst_11 : f32 to vector<8x128xf32>
    %36 = arith.select %30, %6, %35 : vector<8x128xi1>, vector<8x128xf32>
    %cst_12 = arith.constant 0.000000e+00 : f32
    %37 = vector.broadcast %cst_12 : f32 to vector<8x128xf32>
    %38 = arith.select %34, %7, %37 : vector<8x128xi1>, vector<8x128xf32>
    %39 = arith.addf %36, %38 : vector<8x128xf32>
    %40 = arith.addf %4, %39 : vector<8x128xf32>
    %c0_13 = arith.constant 0 : index
    %c0_14 = arith.constant 0 : index
    %41 = vector.load %arg3[%c0_13, %c0_14] : memref<1x128xf32, #tpu.memory_space<vmem>>, vector<1x128xf32>
    %42 = vector.broadcast %41 : vector<1x128xf32> to vector<8x128xf32>
    %43 = arith.addf %40, %42 : vector<8x128xf32>
    %cst_15 = arith.constant 0.000000e+00 : f32
    %44 = vector.broadcast %cst_15 : f32 to vector<8x128xf32>
    %45 = arith.maximumf %43, %44 : vector<8x128xf32>
    %46 = vector.extract_strided_slice %45 {offsets = [0, 0], sizes = [8, 64], strides = [1, 1]} : vector<8x128xf32> to vector<8x64xf32>
    %47 = vector.extract_strided_slice %45 {offsets = [0, 64], sizes = [8, 64], strides = [1, 1]} : vector<8x128xf32> to vector<8x64xf32>
    %48 = arith.maximumf %46, %47 : vector<8x64xf32>
    %49 = vector.shape_cast %48 : vector<8x64xf32> to vector<1x8x64xf32>
    %cst_16 = arith.constant dense<0.000000e+00> : vector<1x64xf32>
    %50 = vector.multi_reduction <add>, %49, %cst_16 [1] : vector<1x8x64xf32> to vector<1x64xf32>
    %c0_17 = arith.constant 0 : index
    %c0_18 = arith.constant 0 : index
    %51 = vector.load %arg4[%c0_17, %c0_18] : memref<64x128xf32, #tpu.memory_space<vmem>>, vector<64x128xf32>
    %cst_19 = arith.constant dense<0.000000e+00> : vector<1x128xf32>
    %52 = tpu.matmul %50, %51, %cst_19 {dimension_numbers = #tpu.dot_dimension_numbers<[1], [0], [0], [1], [0, 0, 1, 1], [], []>} : vector<1x64xf32>, vector<64x128xf32>, vector<1x128xf32> -> vector<1x128xf32>
    %c0_20 = arith.constant 0 : index
    %c0_21 = arith.constant 0 : index
    %53 = vector.load %arg5[%c0_20, %c0_21] : memref<1x128xf32, #tpu.memory_space<vmem>>, vector<1x128xf32>
    %54 = arith.addf %52, %53 : vector<1x128xf32>
    %c0_22 = arith.constant 0 : index
    %c0_23 = arith.constant 0 : index
    %c0_24 = arith.constant 0 : index
    %55 = vector.load %arg6[%c0_22, %c0_23, %c0_24] : memref<1x1x128xf32, #tpu.memory_space<vmem>>, vector<1x1x128xf32>
    %56 = vector.shape_cast %55 : vector<1x1x128xf32> to vector<1x128xf32>
    %57 = vector.shape_cast %54 : vector<1x128xf32> to vector<1x1x128xf32>
    tpu.vector_store %arg6[%c0_22, %c0_23, %c0_24], %57 {strides = array<i32>} : memref<1x1x128xf32, #tpu.memory_space<vmem>>, vector<1x1x128xf32>,
    return
  }
  func.func @transform_0(%arg0: i32) -> (i32, i32, i32) {
    %c0_i32 = arith.constant 0 : i32
    %c0_i32_0 = arith.constant 0 : i32
    %c0_i32_1 = arith.constant 0 : i32
    return %arg0, %c0_i32, %c0_i32_0 : i32, i32, i32
  }
  func.func @transform_1(%arg0: i32) -> (i32, i32) {
    %c0_i32 = arith.constant 0 : i32
    %c0_i32_0 = arith.constant 0 : i32
    %c0_i32_1 = arith.constant 0 : i32
    return %c0_i32, %c0_i32_0 : i32, i32
  }
  func.func @transform_2(%arg0: i32) -> (i32, i32) {
    %c0_i32 = arith.constant 0 : i32
    %c0_i32_0 = arith.constant 0 : i32
    %c0_i32_1 = arith.constant 0 : i32
    return %c0_i32, %c0_i32_0 : i32, i32
  }
  func.func @transform_3(%arg0: i32) -> (i32, i32) {
    %c0_i32 = arith.constant 0 : i32
    %c0_i32_0 = arith.constant 0 : i32
    %c0_i32_1 = arith.constant 0 : i32
    return %c0_i32, %c0_i32_0 : i32, i32
  }
  func.func @transform_4(%arg0: i32) -> (i32, i32) {
    %c0_i32 = arith.constant 0 : i32
    %c0_i32_0 = arith.constant 0 : i32
    %c0_i32_1 = arith.constant 0 : i32
    return %c0_i32, %c0_i32_0 : i32, i32
  }
  func.func @transform_5(%arg0: i32) -> (i32, i32, i32) {
    %c0_i32 = arith.constant 0 : i32
    %c0_i32_0 = arith.constant 0 : i32
    %c0_i32_1 = arith.constant 0 : i32
    return %arg0, %c0_i32, %c0_i32_0 : i32, i32, i32
  }
}

</mosaic_0001>

<bundles_post_ra>
// kernel: tpu_custom_call.1
= control target key start
LH: loop header
LB: loop body
LE: loop exit
PB: predicated region body
PF: predicated region fallthrough
CT: control target
= control target key end

     0   :  { %10 = vsyncpa [#allocation3], 0  ;;  %s1073_s0 = inlined_call_operand.hbm [shape: f32[2,8,8], index: 0, kind: input, shape index: {}]   ;;  %s1074_s1 = inlined_call_operand.hbm [shape: f32[8,256], index: 1, kind: input, shape index: {}]   ;;  %s1075_s2 = inlined_call_operand.vmem [shape: f32[1,128], index: 2, kind: input, shape index: {}]   ;;  %s1076_s3 = inlined_call_operand.hbm [shape: f32[64,128], index: 3, kind: input, shape index: {}]   ;;  %s1077_s4 = inlined_call_operand.vmem [shape: f32[1,128], index: 4, kind: input, shape index: {}]   ;;  %s1078_s5 = inlined_call_operand.hbm [shape: f32[2,1,128], index: 5, kind: output, shape index: {}]  }
   0x1   :  { %12 = vsyncpa [#allocation3 + $0x1], 0 }
   0x2   :  { %13 = vsyncpa [#allocation6], 0 }
   0x3   :  { %14 = vsyncpa [#allocation4], 0 }
   0x4   :  { %16 = vsyncpa [#allocation4 + $0x1], 0  ;;  %s883_s18 = smov 0   ;;  %s885_s19 = smov 0  }
   0x5   :  { %s887_s20 = smov 0   ;;  %s889_s21 = smov 0  }
   0x6 LB: > { %s904_s22 = sadd.s32 4294967295, %s841_s21   ;;  %s575_s23 = sadd.s32 4294967294, %s841_s21   ;;  %s841_s21 = sphi %s889_s21, %s1104_s21   ;;  %s837_s20 = sphi %s887_s20, %s1103_s20   ;;  %s833_s19 = sphi %s885_s19, %s1102_s19   ;;  %s829_s18 = sphi %s883_s18, %s1101_s18  }
   0x7   : > { %p42_p0 = scmp.ne.s32.totalorder %s833_s19, %s829_s18  ;;  %p1079_p1 = scmp.eq.s32.totalorder %s904_s22, 0 }
   0x8   : > { %p156_p3 = scmp.eq.s32.totalorder %s575_s23, 1  ;;  %p576_p5 = scmp.ge.s32.totalorder %s841_s21, 1 }
   0x9   : > { %p913_p4 = por %p1079_p1, %p42_p0  ;;  %p163_p7 = scmp.lt.s32.totalorder %s841_s21, 3 }
   0xa   : > { %p918_p6 = por %p156_p3, %p42_p0  ;;  %s843_s27 = smov [#allocation5]  }
   0xb   : > { %s1083_s24 = scalar_select %p913_p4, 1, 0 }
   0xc   : > { %s1084_s25 = scalar_select %p918_p6, 1, 0 }
   0xd   : > { %p923_p8 = pnand %p576_p5, %p163_p7  ;;  %s176_s28 = sshll.u32 %s843_s27, 4  ;;  %s177_s28 = int_to_ptr.vmem [resolvable:$true] %s176_s28 }
   0xe   : > { %s844_s29 = smov [#allocation7]   ;;  %s704_s7 = scalar_lea.vmem %s177_s28, 256 }
   0xf   : > { %s1085_s26 = scalar_select %p923_p8, 1, 0 }
  0x10   : > { %p632_p10 = pneg %p923_p8  ;;  %s189_s30 = sshll.u32 %s844_s29, 4  ;;  %s190_s30 = int_to_ptr.vmem [resolvable:$true] %s189_s30 }
  0x11   : > { %p705_p13 = scmp.ne.s32.totalorder %s177_s28, %s704_s7  ;;  %p712_p5 = scmp.lt.s32.totalorder %s177_s28, %s177_s28 }
  0x12   : > { %p932_p11 = pnand %p632_p10, %p1079_p1  ;;  %p713_p7 = scmp.lt.s32.totalorder %s704_s7, %s704_s7 }
  0x14   : > { %p695_p12 = pneg %p932_p11  ;;  %p714_p9 = por %p713_p7, %p712_p5 }
  0x16   : > { %p707_p0 = pnand %p705_p13, %p695_p12 }
  0x18   : > { %p708_p3 = pneg %p707_p0 }
  0x1a   : > { %p715_p2 = pnand %p714_p9, %p708_p3 }
  0x1c   : > { %718 = shalt.err (!%p715_p2)
}
  0x1d   : > { %635 = dma.hbm_to_vmem [thread:$0]  (!%p932_p11), %s1074_s1, 256, %s177_s28, [#allocation6]  }
  0x1e   : > { %s730_s10 = scalar_lea.vmem %s190_s30, 1024  ;;  %p738_p13 = scmp.lt.s32.totalorder %s190_s30, %s190_s30 }
  0x1f   : > { %p731_p10 = scmp.ne.s32.totalorder %s190_s30, %s730_s10  ;;  %p739_p0 = scmp.lt.s32.totalorder %s730_s10, %s730_s10 }
  0x21   : > { %p733_p1 = pnand %p731_p10, %p695_p12  ;;  %p740_p4 = por %p739_p0, %p738_p13 }
  0x23   : > { %p734_p6 = pneg %p733_p1 }
  0x25   : > { %p741_p8 = pnand %p740_p4, %p734_p6 }
  0x27   : > { %744 = shalt.err (!%p741_p8)
}
  0x28   : > { %s845_s11 = smov 128   ;;  %s846_s12 = smov 8  }
  0x29   : > { %638 = dma.hbm_to_vmem [thread:$0]  (!%p932_p11), %s1076_s3, 1024, %s190_s30, [#allocation6], %s845_s11, %s845_s11, %s846_s12  }
  0x2a   : > { %s955_s15 = sadd.s32 1, %s841_s21   ;;  %s29_s16 = sadd.s32 1, %s837_s20 }
  0x2b   : > { %s26_s17 = ssub.s32 %s841_s21, %s955_s15  ;;  %p36_p1 = scmp.ne.s32.totalorder %s837_s20, %s833_s19 }
  0x2c   : > { %p27_p2 = scmp.eq.s32.totalorder %s26_s17, 0  ;;  %p37_p4 = scmp.eq.s32.totalorder %s841_s21, 0 }
  0x2d   : > { %p1087_p6 = scmp.eq.s32.totalorder %s904_s22, 1  ;;  %p649_p9 = scmp.lt.s32.totalorder %s841_s21, 2 }
  0x2e   : > { %s971_s27 = scalar_select %p27_p2, %s837_s20, %s29_s16  }
  0x2f   : > { %p965_p8 = por %p1087_p6, %p36_p1  ;;  %p38_p12 = por %p37_p4, %p36_p1 }
  0x30   : > { %s206_s28 = sand.u32 1, %s837_s20   ;;  %s581_s30 = sshll.u32 %s841_s21, 7 }
  0x31   : > { %s1088_s23 = scalar_select %p965_p8, 1, 0 }
  0x32   : > { %s580_s29 = sshll.u32 %s206_s28, 3  ;;  %s978_s8 = scalar_lea.hbm %s1073_s0, %s581_s30 }
  0x33   : > { %s210_s9 = scalar_lea.vmem [#allocation2], %s580_s29  ;;  %p980_p11 = pnand %p649_p9, %p38_p12 }
  0x34   : > { %s217_s10 = sshll.u32 %s210_s9, 4  ;;  %s207_s12 = scalar_lea.sflag [#allocation3], %s206_s28  ;;  %s218_s10 = int_to_ptr.vmem [resolvable:$true] %s217_s10 }
  0x35   : > { %s745_s13 = scalar_lea.hbm %s978_s8, 128  ;;  %p747_p5 = pneg %p980_p11 }
  0x36   : > { %p746_p3 = scmp.ne.s32.totalorder %s978_s8, %s745_s13  ;;  %s750_s17 = scalar_lea.hbm %s1073_s0, 256 }
  0x37   : > { %p751_p13 = scmp.lt.s32.totalorder %s978_s8, %s1073_s0  ;;  %p752_p0 = scmp.lt.s32.totalorder %s750_s17, %s745_s13 }
  0x38   : > { %p748_p7 = pnand %p747_p5, %p746_p3 }
  0x39   : > { %p753_p1 = por %p752_p0, %p751_p13 }
  0x3a   : > { %p749_p10 = pneg %p748_p7 }
  0x3c   : > { %p754_p2 = pnand %p753_p1, %p749_p10 }
  0x3e   : > { %757 = shalt.err (!%p754_p2)
}
  0x3f   : > { %s758_s6 = scalar_lea.vmem %s218_s10, 128  ;;  %s847_s28 = smov [#allocation2]  }
  0x40   : > { %p759_p4 = scmp.ne.s32.totalorder %s218_s10, %s758_s6  ;;  %s763_s7 = sshll.u32 %s847_s28, 4  ;;  %s764_s7 = int_to_ptr.vmem [resolvable:$false] %s763_s7 }
  0x41   : > { %s765_s9 = scalar_lea.vmem %s764_s7, 256  ;;  %p766_p12 = scmp.lt.s32.totalorder %s218_s10, %s764_s7 }
  0x42   : > { %p761_p6 = pnand %p759_p4, %p747_p5  ;;  %p767_p3 = scmp.lt.s32.totalorder %s765_s9, %s758_s6 }
  0x44   : > { %p762_p9 = pneg %p761_p6  ;;  %p768_p7 = por %p767_p3, %p766_p12 }
  0x46   : > { %p769_p8 = pnand %p768_p7, %p762_p9 }
  0x48   : > { %772 = shalt.err (!%p769_p8)
}
  0x49   : > { %642 = dma.hbm_to_vmem [thread:$0]  (!%p980_p11), %s978_s8, 128, %s218_s10, %s207_s12  }
  0x4a   : > { %p1090_p10 = scmp.ne.s32.totalorder %s1085_s26, 0 }
  0x4b   : > { %s1001_s13 = sand.u32 (!%p1090_p10), 1, %s833_s19   ;;  %p1091_p5 = scmp.ne.s32.totalorder (!%p1090_p10), %s1083_s24, 0 }
  0x4c   : > { %226 = sbr.rel (%p1090_p10) target bundleno = 633 (0x279), region = 40  ;;  %s583_s14 = sshll.u32 (!%p1090_p10), %s1001_s13, 3 }
  0x4d   : > { %s229_s16 = scalar_lea.sflag (!%p1090_p10), [#allocation3], %s1001_s13  ;;  %s232_s17 = scalar_lea.vmem (!%p1090_p10), [#allocation2], %s583_s14 }
  0x51   : > { %816 = dma.done.wait (%p1091_p5), %s229_s16, 128  }
  0x52   : > { %818 = vsyncadd (%p1091_p5), %s229_s16, 4294967168  ;;  %p1092_p8 = scmp.eq.s32.totalorder %s904_s22, 0 }
  0x54   : > { %820 = dma.done.wait (%p1092_p8), [#allocation6], 1280   ;;  %p1093_p11 = pmov %p1092_p8 }
  0x55   : > { %v848_v0 = vmov 0.0   ;;  %v268_v1 = vld [vmem:[#allocation5 + $0x8] sm:$0xff]  ;;  %v267_v2 = vld [vmem:[#allocation5] sm:$0xff]  ;;  %v266_v3 = vld [vmem:[%s232_s17] sm:$0xff]  ;;  %vm269_vm0 = vcmask 64512   ;;  %v346_v4 = vlaneseq  ;;  %vm849_vm3 = vmmov 1  }
  0x56   : > { %822 = vsyncadd (%p1093_p11), [#allocation6], 4294966016  ;;  %337 = vmatprep.mubr.f32.mxu0 %v848_v0  ;;  %601 = vmatprep.subr.mxu1 %v848_v0  ;;  %v401_v11 = vld [vmem:[#allocation7 + $0x38] sm:$0xff]  ;;  %v400_v13 = vld [vmem:[#allocation7 + $0x30] sm:$0xff]  ;;  %vm850_vm8 = vmmov 0   ;;  %s851_s8 = smov 64  }
  0x57   : > { %303 = vmatprep.subr.mxu0 %v268_v1  ;;  %v347_v5 = vshrl.u32 %v346_v4, 7  ;;  %v361_v6 = vand.u32 127, %v346_v4  ;;  %602 = vmatpush3.msra.mxu1 %v401_v11  ;;  %v399_v16 = vld [vmem:[#allocation7 + $0x28] sm:$0xff]  ;;  %v398_v20 = vld [vmem:[#allocation7 + $0x20] sm:$0xff]  ;;  %v397_v23 = vld [vmem:[#allocation7 + $0x18] sm:$0xff]  ;;  %vm386_vm9 = vcmask 523264  }
  0x58   : > { %304 = vmatpush1.msra.mxu0 %v267_v2  ;;  %603 = vmatprep.subr.mxu1 %v848_v0  ;;  %v587_v21 = vld [vmem:[%s1075_s2] ss:$0 sm:$0xff]  ;;  %v396_v25 = vld [vmem:[#allocation7 + $0x10] sm:$0xff]  ;;  %v395_v27 = vld [vmem:[#allocation7 + $0x8] sm:$0xff]  ;;  %s589_s12 = sshll.u32 %s904_s22, 4  ;;  %s265_s30 = scalar_lea.vmem [#allocation8], %s1001_s13 }
  0x59   : > { %586 = vmatmul.mubr.msk.f32.vlgmr.msra.gmra.mxu0 %vm269_vm0, %v266_v3  ;;  %v352_v7 = vand.u32 7, %v347_v5  ;;  %vm362_vm1 = vcmp.lt.s32.totalorder %v361_v6, 64  ;;  %604 = vmatpush3.msra.mxu1 %v400_v13  ;;  %v394_v28 = vld [vmem:[#allocation7] sm:$0xff]  ;;  %s490_s29 = sshll.u32 %s265_s30, 4  ;;  %s1036_s7 = scalar_lea.hbm %s1078_s5, %s589_s12  ;;  %s491_s29 = int_to_ptr.vmem [resolvable:$true] %s490_s29 }
  0x5a   : > { %vm1013_vm4 = vmxor %vm362_vm1, %vm849_vm3  ;;  %605 = vmatprep.subr.mxu1 %v848_v0  ;;  %617 = vmatprep.mubr.msk.f32.mxu1 %vm850_vm8, %v848_v0  ;;  %v402_v38 = vld [vmem:[%s1077_s4] sm:$0x1]  ;;  %s478_s9 = scalar_lea.sflag [#allocation4], %s1001_s13  ;;  %s773_s14 = scalar_lea.vmem %s491_s29, 16 }
  0x5b   : > { %vm363_vm2 = vcmp.gt.s32.totalorder %v352_v7, 0  ;;  %vm1017_vm5 = vcmp.lt.s32.totalorder %v352_v7, 7  ;;  %606 = vmatpush3.msra.mxu1 %v399_v16  ;;  %p774_p13 = scmp.ne.s32.totalorder %s491_s29, %s773_s14  ;;  %p1098_p0 = scmp.ne.s32.totalorder %s1088_s23, 0 }
  0x5c   : > { %vm364_vm6 = vmand %vm362_vm1, %vm363_vm2  ;;  %607 = vmatprep.subr.mxu1 %v848_v0  ;;  %s852_s16 = smov [#allocation8]  }
  0x5d   : > { %vm367_vm7 = vmand %vm1013_vm4, %vm1017_vm5  ;;  %608 = vmatpush3.msra.mxu1 %v398_v20  ;;  %p775_p1 = pnand %p774_p13, %p1098_p0  ;;  %s777_s22 = sshll.u32 %s852_s16, 4  ;;  %s778_s22 = int_to_ptr.vmem [resolvable:$false] %s777_s22 }
  0x5e   : > { %609 = vmatprep.subr.mxu1 %v848_v0  ;;  %s779_s17 = scalar_lea.vmem %s778_s22, 32  ;;  %p780_p4 = scmp.lt.s32.totalorder %s491_s29, %s778_s22 }
  0x5f   : > { %610 = vmatpush3.msra.mxu1 %v397_v23  ;;  %p776_p2 = pneg %p775_p1  ;;  %p781_p6 = scmp.lt.s32.totalorder %s779_s17, %s773_s14 }
  0x60   : > { %611 = vmatprep.subr.mxu1 %v848_v0 }
  0x61   : > { %612 = vmatpush3.msra.mxu1 %v396_v25  ;;  %p782_p9 = por %p781_p6, %p780_p4 }
  0x62   : > { %613 = vmatprep.subr.mxu1 %v848_v0 }
  0x63   : > { %614 = vmatpush3.msra.mxu1 %v395_v27  ;;  %p783_p12 = pnand %p782_p9, %p776_p2 }
  0x64   : > { %615 = vmatprep.subr.mxu1 %v848_v0 }
  0x65   : > { %616 = vmatpush3.msra.mxu1 %v394_v28 }
 0x119   : > { %v339_v10 = vpop.f32.mrf.mxu0 }
 0x11b   : > { %v341_v12 = vpop.f32.mrf.mxu0 }
 0x11c   : > { %v344_v14 = vrot.slane %v341_v12, 7  ;;  %v345_v15 = vrot.slane %v341_v12, 1 }
 0x11e   : > { %v368_v17 = vsel %vm364_vm6, %v344_v14, 0.0  ;;  %v369_v18 = vsel %vm367_vm7, %v345_v15, 0.0 }
 0x11f   : > { %v370_v19 = vadd.f32 %v369_v18, %v368_v17 }
 0x121   : > { %v371_v22 = vadd.f32 %v370_v19, %v339_v10 }
 0x123   : > { %v379_v24 = vadd.f32 %v587_v21, %v371_v22 }
 0x125   : > { %v380_v26 = vmax.f32 %v379_v24, 0.0 }
 0x127   : > { %382 = vrot.lane.b32.xlu0 %v380_v26, %s851_s8 }
 0x199   : > { %v383_v29 = vpop.permute.xlu0 %382 }
 0x19a   : > { %v385_v30 = vmax.f32 %v380_v26, %v383_v29 }
 0x19c   : > { %v387_v31 = vsel %vm386_vm9, %v385_v30, 0.0 }
 0x19d   : > { %v388_v32 = vrot.slane %v387_v31, 4 }
 0x19f   : > { %v389_v33 = vadd.f32 %v388_v32, %v387_v31 }
 0x1a1   : > { %v390_v34 = vrot.slane %v389_v33, 2 }
 0x1a3   : > { %v391_v35 = vadd.f32 %v390_v34, %v389_v33 }
 0x1a5   : > { %v392_v36 = vrot.slane %v391_v35, 1 }
 0x1a7   : > { %v393_v37 = vadd.f32 %v392_v36, %v391_v35 }
 0x1a9   : > { %618 = vmatmul.mubr.msk.f32.vlgmr.msra.gmra.mxu1 %vm386_vm9, %v393_v37 }
 0x269   : > { %v472_v39 = vpop.f32.mrf.mxu1 }
 0x26a   : > { %v473_v40 = vadd.f32 %v472_v39, %v402_v38 }
 0x26b   : > { %v619_v41 = vpop.f32.mrf.mxu1 }
 0x26c   : > { %476 = vst [vmem:[%s265_s30] sm:$0x1] %v473_v40 }
 0x26d   : > { %786 = shalt.err (!%p783_p12)
}
 0x26e   : > { %s787_s24 = scalar_lea.hbm %s1036_s7, 16  ;;  %s791_s8 = scalar_lea.hbm %s1078_s5, 32 }
 0x26f   : > { %p788_p3 = scmp.ne.s32.totalorder %s1036_s7, %s787_s24  ;;  %p792_p5 = scmp.lt.s32.totalorder %s1036_s7, %s1078_s5 }
 0x270   : > { %p793_p8 = scmp.lt.s32.totalorder %s791_s8, %s787_s24 }
 0x271   : > { %p789_p7 = pnand %p788_p3, %p1098_p0 }
 0x272   : > { %p794_p11 = por %p793_p8, %p792_p5 }
 0x273   : > { %p790_p10 = pneg %p789_p7 }
 0x275   : > { %p795_p13 = pnand %p794_p11, %p790_p10 }
 0x277   : > { %798 = shalt.err (!%p795_p13)
}
 0x278   : > { %630 = dma.vmem_to_hbm [thread:$0]  (%p1098_p0), %s491_s29, 16, %s1036_s7, %s478_s9  }
 0x279 PF: > { %s502_s12 = sand.u32 1, %s829_s18   ;;  %p1099_p1 = scmp.ne.s32.totalorder %s1084_s25, 0 }
 0x27a   : > { %p1100_p2 = scmp.ge.s32.totalorder %s841_s21, 2  ;;  %s503_s30 = scalar_lea.sflag [#allocation4], %s502_s12 }
 0x27c   : > { %p644_p4 = pnand %p1100_p2, %p1099_p1 }
 0x27e   : > { %p645_p6 = pneg %p644_p4 }
 0x280   : > { %824 = dma.done.wait (%p645_p6), %s503_s30, 16  }
 0x281   : > { %826 = vsyncadd (%p645_p6), %s503_s30, 4294967280  ;;  %p19_p9 = scmp.ge.s32.totalorder %s955_s15, 4   ;;  %s1101_s18 = smov %s833_s19 }
 0x282   : > { %s1102_s19 = smov %s837_s20  ;;  %s1103_s20 = smov %s971_s27 }
 0x283   : > { %s1104_s21 = smov %s955_s15  ;;  %21 = sbr.rel (!%p19_p9) target bundleno = 6 (0x6), region = 93 }
 0x288   :  { %507 = vsyncpa [#allocation3], 1 }
 0x289   :  { %509 = vsyncpa [#allocation3 + $0x1], 1 }
 0x28a   :  { %510 = vsyncpa [#allocation6], 1 }
 0x28b   :  { %511 = vsyncpa [#allocation4], 1 }
 0x28c   :  { %513 = vsyncpa [#allocation4 + $0x1], 1 }

</bundles_post_ra>
